<compile_context>
chip_gen: v7x
topology: tpu7x:2x2x1
jax: 0.10.0
libtpu: 0.0.40
codegen_flags: <defaults>
</compile_context>

<pallas_src>
import jax
import jax.numpy as jnp
from jax.experimental import pallas as pl
from jax.experimental.pallas import tpu as pltpu

EPS = 1e-5  # nn.InstanceNorm1d default eps


def _make_kernel(*, nb, in_ch, out_ch, k_sz, dil, t_in, t_out, pad_left,
                 use_glu, mm_dtype):
    """Builds the kernel body with all static shape/flag parameters closed over."""

    def kernel(x_ref, w_ref, o_ref, xs_ref):
        # ------------------------------------------------------------------
        # Stage tap windows (with implicit zero padding) into the stacked
        # operand:  xs[k*in_ch + i, b*t_out + t] == x_pad[b, i, t + k*dil]
        # All offsets are static; reads come straight from the input Ref.
        # ------------------------------------------------------------------
        for k in range(k_sz):
            s = k * dil - pad_left              # window start in unpadded x coords
            src_lo = max(s, 0)
            src_hi = min(s + t_out, t_in)
            width = max(src_hi - src_lo, 0)
            dst_lo = src_lo - s                 # left zero-fill width
            dst_hi = dst_lo + width
            row = k * in_ch
            for b in range(nb):
                col = b * t_out
                if dst_lo > 0:                  # left padding region
                    xs_ref[row:row + in_ch, col:col + dst_lo] = jnp.zeros(
                        (in_ch, dst_lo), mm_dtype)
                if width > 0:                   # valid data window
                    xs_ref[row:row + in_ch, col + dst_lo:col + dst_hi] = (
                        x_ref[b, :, src_lo:src_hi].astype(mm_dtype))
                if dst_hi < t_out:              # right padding region
                    xs_ref[row:row + in_ch, col + dst_hi:col + t_out] = jnp.zeros(
                        (in_ch, t_out - dst_hi), mm_dtype)

        # ------------------------------------------------------------------
        # One lane-wide MXU matmul for all taps and all batch elements.
        # ------------------------------------------------------------------
        acc = jnp.dot(w_ref[...], xs_ref[...],
                      preferred_element_type=jnp.float32)   # (2*out_ch, nb*t_out) f32

        # ------------------------------------------------------------------
        # Per-batch InstanceNorm (two-pass) + highway / GLU gate.
        # ------------------------------------------------------------------
        for b in range(nb):
            h = acc[:, b * t_out:(b + 1) * t_out]            # (2*out_ch, t_out)
            mean = jnp.mean(h, axis=-1, keepdims=True)
            c = h - mean
            var = jnp.mean(c * c, axis=-1, keepdims=True)
            hn = c * jax.lax.rsqrt(var + EPS)
            h1 = hn[:out_ch]
            h2 = hn[out_ch:]
            if use_glu:
                # nn.GLU(dim=1): a * sigmoid(b)
                o_ref[b] = h1 * jax.nn.sigmoid(h2)
            else:
                # Highway residual (x kept f32 on this path; t_out == t_in).
                res = x_ref[b].astype(jnp.float32)
                g = jax.nn.sigmoid(h1)
                o_ref[b] = g * h2 + (1.0 - g) * res

    return kernel


def _vmem_capacity_bytes():
    try:
        return int(pltpu.get_tpu_info().vmem_capacity_bytes)
    except Exception:
        return 64 << 20   # conservative default (v7x per-TensorCore VMEM)


def _pick_nb(n, per_elem_bytes, budget):
    """Largest divisor of n fitting the VMEM budget; grid kept >= 2 when n >= 2."""
    cap = max(1, min(n, budget // max(per_elem_bytes, 1)))
    if n >= 2:
        cap = max(1, min(cap, n // 2))   # v7x: let the 2 TensorCores both get work
    for nb in range(int(cap), 0, -1):
        if n % nb == 0:
            return nb
    return 1


def highway_layer_forward(x, weight, bias=None, *, out_ch, k_sz, dil,
                          causality=False, use_glu=False,
                          matmul_dtype=jnp.float32):
    """Forward pass of HighwayLayer.

    x:      (N, in_ch, T) float32
    weight: (2*out_ch, in_ch, k_sz) Conv1d weight
    bias:   (2*out_ch,) or None. Accepted for API parity but unused: a per-channel
            constant is exactly removed by InstanceNorm1d(affine=False).
    matmul_dtype: operand dtype for the MXU matmul (bf16 recommended on v6e/v7x);
            accumulation, normalization, gate and (non-GLU) residual stay float32.
    """
    del bias  # mathematically a no-op under InstanceNorm1d(affine=False)
    n, in_ch, t_in = x.shape
    mm_dtype = jnp.dtype(matmul_dtype)

    # Padding exactly as in the PyTorch forward (handled inside the kernel).
    if k_sz != 1:
        pad = (dil * (k_sz - 1), 0) if causality else (dil, dil)
    else:
        pad = (0, 0)
    pad_left = pad[0]
    t_out = t_in + pad[0] + pad[1] - dil * (k_sz - 1)

    if not use_glu:
        # Highway residual needs out == x shapes (as in the PyTorch module semantics).
        assert in_ch == out_ch and t_out == t_in, \
            "highway (non-GLU) path requires in_ch == out_ch and t_out == T"

    # Fused conv weight: w[o, k*in_ch + i] = weight[o, i, k].
    w_arr = jnp.transpose(weight, (0, 2, 1)).reshape(2 * out_ch, k_sz * in_ch)
    w_arr = w_arr.astype(mm_dtype)

    # bf16 activations are cast once here (halves the HBM read of x); the non-GLU
    # path keeps x in f32 so the residual matches PyTorch exactly.
    x_dtype = mm_dtype if use_glu else jnp.float32
    x_in = x.astype(x_dtype)
    x_isz = jnp.dtype(x_dtype).itemsize
    mm_isz = mm_dtype.itemsize

    # Generation-aware batch blocking (amortizes the ~0.35us per-grid-step overhead).
    vmem_cap = _vmem_capacity_bytes()
    budget = min(max(vmem_cap // 5, 8 << 20), 48 << 20)
    per_elem = (2 * (in_ch * t_in * x_isz + out_ch * t_out * 4)
                + k_sz * in_ch * t_out * mm_isz)
    nb = _pick_nb(n, per_elem, budget)

    kernel = _make_kernel(nb=nb, in_ch=in_ch, out_ch=out_ch, k_sz=k_sz, dil=dil,
                          t_in=t_in, t_out=t_out, pad_left=pad_left,
                          use_glu=use_glu, mm_dtype=mm_dtype)

    x_spec = pl.BlockSpec((nb, in_ch, t_in), lambda g: (g, 0, 0))
    w_spec = pl.BlockSpec((2 * out_ch, k_sz * in_ch), lambda g: (0, 0))
    out_spec = pl.BlockSpec((nb, out_ch, t_out), lambda g: (g, 0, 0))

    # VMEM accounting: double-buffered in/out blocks + resident weight + staged operand.
    x_bytes = nb * in_ch * t_in * x_isz
    o_bytes = nb * out_ch * t_out * 4
    w_bytes = int(w_arr.size) * w_arr.dtype.itemsize
    xs_bytes = k_sz * in_ch * nb * t_out * mm_isz
    needed = 2 * (x_bytes + o_bytes) + w_bytes + xs_bytes
    vmem_limit = int(min(max(needed + (8 << 20), 16 << 20), vmem_cap - (8 << 20)))

    return pl.pallas_call(
        kernel,
        out_shape=jax.ShapeDtypeStruct((n, out_ch, t_out), jnp.float32),
        grid_spec=pltpu.PrefetchScalarGridSpec(
            num_scalar_prefetch=0,
            grid=(n // nb,),
            in_specs=[x_spec, w_spec],
            out_specs=out_spec,
            scratch_shapes=[pltpu.VMEM((k_sz * in_ch, nb * t_out), mm_dtype)],
        ),
        compiler_params=pltpu.CompilerParams(
            dimension_semantics=("parallel",),
            vmem_limit_bytes=vmem_limit,
        ),
    )(x_in, w_arr)


def reference_forward(x, weight, bias, *, out_ch, k_sz, dil,
                      causality=False, use_glu=False):
    """Pure-JAX reference reproducing the PyTorch forward (bias included)."""
    if k_sz != 1:
        pad = (dil * (k_sz - 1), 0) if causality else (dil, dil)
    else:
        pad = (0, 0)
    x_pad = jnp.pad(x, ((0, 0), (0, 0), pad))
    h = jax.lax.conv_general_dilated(
        x_pad, weight, window_strides=(1,), padding="VALID",
        rhs_dilation=(dil,), dimension_numbers=("NCH", "OIH", "NCH"))
    h = h + bias[None, :, None]
    mean = h.mean(axis=-1, keepdims=True)
    var = ((h - mean) ** 2).mean(axis=-1, keepdims=True)
    hn = (h - mean) / jnp.sqrt(var + EPS)
    h1, h2 = hn[:, :out_ch, :], hn[:, out_ch:, :]
    if use_glu:
        return h1 * jax.nn.sigmoid(h2)
    s = jax.nn.sigmoid(h1)
    return s * h2 + (1.0 - s) * x


if __name__ == "__main__":
    root = jax.random.PRNGKey(0)
    N, T = 2, 16

    # (name, in_ch, out_ch, k_sz, dil, causality, use_glu, matmul_dtype, atol, rtol)
    cases = [
        ("highway_causal_f32",    4, 4, 2, 2, True,  False, jnp.float32,  2e-4, 2e-4),
        ("glu_f32",               8, 4, 3, 1, False, True,  jnp.float32,  2e-4, 2e-4),
        ("highway_symmetric_f32", 8, 8, 3, 2, False, False, jnp.float32,  2e-4, 2e-4),
        ("glu_bf16_matmul",       8, 4, 3, 1, False, True,  jnp.bfloat16, 5e-2, 5e-2),
    ]

    for i, (name, in_ch, oc, k_sz, dil, causal, use_glu, mm_dt, atol, rtol) in enumerate(cases):
        kx, kw, kb = jax.random.split(jax.random.fold_in(root, i), 3)
        x = jax.random.normal(kx, (N, in_ch, T), jnp.float32)
        weight = 0.3 * jax.random.normal(kw, (2 * oc, in_ch, k_sz), jnp.float32)
        bias = 0.1 * jax.random.normal(kb, (2 * oc,), jnp.float32)

        out = highway_layer_forward(x, weight, bias, out_ch=oc, k_sz=k_sz, dil=dil,
                                    causality=causal, use_glu=use_glu,
                                    matmul_dtype=mm_dt)
        out = jax.block_until_ready(out)

        ref = reference_forward(x, weight, bias, out_ch=oc, k_sz=k_sz, dil=dil,
                                causality=causal, use_glu=use_glu)
        assert out.shape == ref.shape, f"{name}: shape {out.shape} vs {ref.shape}"
        err = float(jnp.max(jnp.abs(out - ref)))
        assert jnp.allclose(out, ref, atol=atol, rtol=rtol), \
            f"{name}: mismatch vs reference, max abs err {err}"

    print("KERNEL_OK")
</pallas_src>

<mosaic_0001>
module attributes {stable_mosaic.version = 11 : i64} {
  func.func @kernel(%arg0: i32, %arg1: memref<1x4x16xf32, #tpu.memory_space<vmem>>, %arg2: memref<8x8xf32, #tpu.memory_space<vmem>>, %arg3: memref<1x4x16xf32, #tpu.memory_space<vmem>>, %arg4: memref<8x16xf32, #tpu.memory_space<vmem>>) attributes {dimension_semantics = [#tpu.dimension_semantics<parallel>], iteration_bounds = array<i64: 2>, scalar_prefetch = 0 : i64, scratch_operands = 1 : i64, tpu.core_type = #tpu.core_type<tc>, window_params = [{transform_indices = @transform_0, window_bounds = array<i64: 1, 4, 16>}, {pipeline_mode = #tpu.pipeline_mode<synchronous>, transform_indices = @transform_1, window_bounds = array<i64: 8, 8>}, {transform_indices = @transform_2, window_bounds = array<i64: 1, 4, 16>}]} {
    %cst = arith.constant 0.000000e+00 : f32
    %0 = vector.broadcast %cst : f32 to vector<4x2xf32>
    %c0 = arith.constant 0 : index
    %c0_0 = arith.constant 0 : index
    %1 = vector.load %arg4[%c0, %c0_0] : memref<8x16xf32, #tpu.memory_space<vmem>>, vector<4x2xf32>
    tpu.vector_store %arg4[%c0, %c0_0], %0 {strides = array<i32>} : memref<8x16xf32, #tpu.memory_space<vmem>>, vector<4x2xf32>,
    %c0_1 = arith.constant 0 : index
    %c0_2 = arith.constant 0 : index
    %c0_3 = arith.constant 0 : index
    %2 = vector.load %arg1[%c0_1, %c0_2, %c0_3] : memref<1x4x16xf32, #tpu.memory_space<vmem>>, vector<1x4x14xf32>
    %3 = vector.shape_cast %2 : vector<1x4x14xf32> to vector<4x14xf32>
    %c0_4 = arith.constant 0 : index
    %c2 = arith.constant 2 : index
    %4 = vector.load %arg4[%c0_4, %c2] : memref<8x16xf32, #tpu.memory_space<vmem>>, vector<4x14xf32>
    tpu.vector_store %arg4[%c0_4, %c2], %3 {strides = array<i32>} : memref<8x16xf32, #tpu.memory_space<vmem>>, vector<4x14xf32>,
    %c0_5 = arith.constant 0 : index
    %c0_6 = arith.constant 0 : index
    %c0_7 = arith.constant 0 : index
    %5 = vector.load %arg1[%c0_5, %c0_6, %c0_7] : memref<1x4x16xf32, #tpu.memory_space<vmem>>, vector<1x4x16xf32>
    %6 = vector.shape_cast %5 : vector<1x4x16xf32> to vector<4x16xf32>
    %c4 = arith.constant 4 : index
    %c0_8 = arith.constant 0 : index
    %7 = vector.load %arg4[%c4, %c0_8] : memref<8x16xf32, #tpu.memory_space<vmem>>, vector<4x16xf32>
    tpu.vector_store %arg4[%c4, %c0_8], %6 {strides = array<i32>} : memref<8x16xf32, #tpu.memory_space<vmem>>, vector<4x16xf32>,
    %c0_9 = arith.constant 0 : index
    %c0_10 = arith.constant 0 : index
    %8 = vector.load %arg2[%c0_9, %c0_10] : memref<8x8xf32, #tpu.memory_space<vmem>>, vector<8x8xf32>
    %c0_11 = arith.constant 0 : index
    %c0_12 = arith.constant 0 : index
    %9 = vector.load %arg4[%c0_11, %c0_12] : memref<8x16xf32, #tpu.memory_space<vmem>>, vector<8x16xf32>
    %cst_13 = arith.constant dense<0.000000e+00> : vector<8x16xf32>
    %10 = tpu.matmul %8, %9, %cst_13 {dimension_numbers = #tpu.dot_dimension_numbers<[1], [0], [0], [1], [0, 0, 1, 1], [], []>} : vector<8x8xf32>, vector<8x16xf32>, vector<8x16xf32> -> vector<8x16xf32>
    %cst_14 = arith.constant dense<0.000000e+00> : vector<8xf32>
    %11 = vector.multi_reduction <add>, %10, %cst_14 [1] : vector<8x16xf32> to vector<8xf32>
    %12 = vector.shape_cast %11 : vector<8xf32> to vector<8x1xf32>
    %cst_15 = arith.constant 1.600000e+01 : f32
    %13 = vector.broadcast %cst_15 : f32 to vector<8x1xf32>
    %14 = arith.divf %12, %13 : vector<8x1xf32>
    %15 = vector.broadcast %14 : vector<8x1xf32> to vector<8x16xf32>
    %16 = arith.subf %10, %15 : vector<8x16xf32>
    %17 = arith.mulf %16, %16 : vector<8x16xf32>
    %cst_16 = arith.constant dense<0.000000e+00> : vector<8xf32>
    %18 = vector.multi_reduction <add>, %17, %cst_16 [1] : vector<8x16xf32> to vector<8xf32>
    %19 = vector.shape_cast %18 : vector<8xf32> to vector<8x1xf32>
    %cst_17 = arith.constant 1.600000e+01 : f32
    %20 = vector.broadcast %cst_17 : f32 to vector<8x1xf32>
    %21 = arith.divf %19, %20 : vector<8x1xf32>
    %cst_18 = arith.constant 9.99999974E-6 : f32
    %22 = vector.broadcast %cst_18 : f32 to vector<8x1xf32>
    %23 = arith.addf %21, %22 : vector<8x1xf32>
    %24 = math.rsqrt %23 : vector<8x1xf32>
    %25 = vector.broadcast %24 : vector<8x1xf32> to vector<8x16xf32>
    %26 = arith.mulf %16, %25 : vector<8x16xf32>
    %27 = vector.extract_strided_slice %26 {offsets = [0, 0], sizes = [4, 16], strides = [1, 1]} : vector<8x16xf32> to vector<4x16xf32>
    %28 = vector.extract_strided_slice %26 {offsets = [4, 0], sizes = [4, 16], strides = [1, 1]} : vector<8x16xf32> to vector<4x16xf32>
    %c0_19 = arith.constant 0 : index
    %c0_20 = arith.constant 0 : index
    %c0_21 = arith.constant 0 : index
    %29 = vector.load %arg1[%c0_19, %c0_20, %c0_21] : memref<1x4x16xf32, #tpu.memory_space<vmem>>, vector<1x4x16xf32>
    %30 = vector.shape_cast %29 : vector<1x4x16xf32> to vector<4x16xf32>
    %31 = arith.negf %27 : vector<4x16xf32>
    %32 = math.exp %31 : vector<4x16xf32>
    %cst_22 = arith.constant 1.000000e+00 : f32
    %33 = vector.broadcast %cst_22 : f32 to vector<4x16xf32>
    %34 = arith.addf %33, %32 : vector<4x16xf32>
    %35 = arith.divf %33, %34 : vector<4x16xf32>
    %36 = arith.mulf %35, %28 : vector<4x16xf32>
    %cst_23 = arith.constant 1.000000e+00 : f32
    %37 = vector.broadcast %cst_23 : f32 to vector<4x16xf32>
    %38 = arith.subf %37, %35 : vector<4x16xf32>
    %39 = arith.mulf %38, %30 : vector<4x16xf32>
    %40 = arith.addf %36, %39 : vector<4x16xf32>
    %c0_24 = arith.constant 0 : index
    %c0_25 = arith.constant 0 : index
    %c0_26 = arith.constant 0 : index
    %41 = vector.load %arg3[%c0_24, %c0_25, %c0_26] : memref<1x4x16xf32, #tpu.memory_space<vmem>>, vector<1x4x16xf32>
    %42 = vector.shape_cast %41 : vector<1x4x16xf32> to vector<4x16xf32>
    %43 = vector.shape_cast %40 : vector<4x16xf32> to vector<1x4x16xf32>
    tpu.vector_store %arg3[%c0_24, %c0_25, %c0_26], %43 {strides = array<i32>} : memref<1x4x16xf32, #tpu.memory_space<vmem>>, vector<1x4x16xf32>,
    return
  }
  func.func @transform_0(%arg0: i32) -> (i32, i32, i32) {
    %c0_i32 = arith.constant 0 : i32
    %c0_i32_0 = arith.constant 0 : i32
    %c0_i32_1 = arith.constant 0 : i32
    return %arg0, %c0_i32, %c0_i32_0 : i32, i32, i32
  }
  func.func @transform_1(%arg0: i32) -> (i32, i32) {
    %c0_i32 = arith.constant 0 : i32
    %c0_i32_0 = arith.constant 0 : i32
    %c0_i32_1 = arith.constant 0 : i32
    return %c0_i32, %c0_i32_0 : i32, i32
  }
  func.func @transform_2(%arg0: i32) -> (i32, i32, i32) {
    %c0_i32 = arith.constant 0 : i32
    %c0_i32_0 = arith.constant 0 : i32
    %c0_i32_1 = arith.constant 0 : i32
    return %arg0, %c0_i32, %c0_i32_0 : i32, i32, i32
  }
}

</mosaic_0001>

<bundles_post_ra>
// kernel: tpu_custom_call.1
= control target key start
LH: loop header
LB: loop body
LE: loop exit
PB: predicated region body
PF: predicated region fallthrough
CT: control target
= control target key end

     0   :  { %7 = vsyncpa [#allocation4], 0  ;;  %s836_s0 = inlined_call_operand.hbm [shape: f32[2,4,16], index: 0, kind: input, shape index: {}]   ;;  %s837_s1 = inlined_call_operand.hbm [shape: f32[8,8], index: 1, kind: input, shape index: {}]   ;;  %s838_s2 = inlined_call_operand.hbm [shape: f32[2,4,16], index: 2, kind: output, shape index: {}]  }
   0x1   :  { %9 = vsyncpa [#allocation4 + $0x1], 0 }
   0x2   :  { %10 = vsyncpa [#allocation7], 0 }
   0x3   :  { %11 = vsyncpa [#allocation5], 0 }
   0x4   :  { %13 = vsyncpa [#allocation5 + $0x1], 0  ;;  %s624_s9 = smov 0   ;;  %s626_s10 = smov 0  }
   0x5   :  { %s628_s11 = smov 0   ;;  %s630_s12 = smov 0  }
   0x6 LB: > { %s645_s13 = sadd.s32 4294967295, %s601_s12   ;;  %s384_s14 = sadd.s32 4294967294, %s601_s12   ;;  %s601_s12 = sphi %s630_s12, %s862_s12   ;;  %s597_s11 = sphi %s628_s11, %s861_s11   ;;  %s593_s10 = sphi %s626_s10, %s860_s10   ;;  %s589_s9 = sphi %s624_s9, %s859_s9  }
   0x7   : > { %p39_p0 = scmp.ne.s32.totalorder %s593_s10, %s589_s9  ;;  %p839_p1 = scmp.eq.s32.totalorder %s645_s13, 0 }
   0x8   : > { %p90_p3 = scmp.eq.s32.totalorder %s384_s14, 1  ;;  %p385_p5 = scmp.ge.s32.totalorder %s601_s12, 1 }
   0x9   : > { %p654_p4 = por %p839_p1, %p39_p0  ;;  %p97_p7 = scmp.lt.s32.totalorder %s601_s12, 3 }
   0xa   : > { %p659_p6 = por %p90_p3, %p39_p0  ;;  %s603_s18 = smov [#allocation6]  }
   0xb   : > { %s842_s15 = scalar_select %p654_p4, 1, 0 }
   0xc   : > { %s843_s16 = scalar_select %p659_p6, 1, 0 }
   0xd   : > { %p664_p8 = pnand %p385_p5, %p97_p7  ;;  %s110_s19 = sshll.u32 %s603_s18, 4  ;;  %s111_s19 = int_to_ptr.vmem [resolvable:$true] %s110_s19 }
   0xe   : > { %s672_s20 = sadd.s32 1, %s601_s12   ;;  %s26_s24 = sadd.s32 1, %s597_s11 }
   0xf   : > { %s844_s17 = scalar_select %p664_p8, 1, 0 }
  0x10   : > { %p415_p10 = pneg %p664_p8  ;;  %s23_s22 = ssub.s32 %s601_s12, %s672_s20 }
  0x11   : > { %p682_p12 = scmp.eq.s32.totalorder %s23_s22, 0  ;;  %s473_s27 = scalar_lea.hbm %s837_s1, 128 }
  0x12   : > { %p676_p11 = pnand %p415_p10, %p839_p1  ;;  %p474_p0 = scmp.ne.s32.totalorder %s837_s1, %s473_s27 }
  0x13   : > { %s846_s23 = scalar_select %p682_p12, 1, 0 }
  0x14   : > { %p475_p3 = pneg %p676_p11  ;;  %p480_p10 = scmp.lt.u32.totalorder %s473_s27, %s837_s1 }
  0x16   : > { %p476_p5 = pnand %p475_p3, %p474_p0 }
  0x18   : > { %p477_p7 = pneg %p476_p5 }
  0x1a   : > { %p482_p9 = pnand %p480_p10, %p477_p7 }
  0x1c   : > { %485 = shalt.err (!%p482_p9)
}
  0x1d   : > { %s486_s4 = scalar_lea.vmem %s111_s19, 128  ;;  %p494_p6 = scmp.lt.s32.totalorder %s111_s19, %s111_s19 }
  0x1e   : > { %p487_p1 = scmp.ne.s32.totalorder %s111_s19, %s486_s4  ;;  %p495_p4 = scmp.lt.s32.totalorder %s486_s4, %s486_s4 }
  0x20   : > { %p489_p2 = pnand %p487_p1, %p475_p3  ;;  %p496_p8 = por %p495_p4, %p494_p6 }
  0x22   : > { %p490_p13 = pneg %p489_p2 }
  0x24   : > { %p497_p12 = pnand %p496_p8, %p490_p13 }
  0x26   : > { %500 = shalt.err (!%p497_p12)
}
  0x27   : > { %418 = dma.hbm_to_vmem [thread:$0]  (!%p676_p11), %s837_s1, 128, %s111_s19, [#allocation7]  }
  0x28   : > { %p847_p1 = scmp.ne.s32.totalorder %s846_s23, 0  ;;  %p34_p2 = scmp.eq.s32.totalorder %s601_s12, 0 }
  0x29   : > { %p848_p4 = scmp.ne.s32.totalorder %s597_s11, %s593_s10  ;;  %p849_p6 = scmp.eq.s32.totalorder %s645_s13, 1 }
  0x2a   : > { %s708_s7 = scalar_select %p847_p1, %s597_s11, %s26_s24  }
  0x2b   : > { %p716_p8 = por %p849_p6, %p848_p4  ;;  %p428_p9 = scmp.lt.s32.totalorder %s601_s12, 2 }
  0x2c   : > { %s121_s14 = sand.u32 1, %s597_s11   ;;  %p851_p12 = pmov %p848_p4 }
  0x2d   : > { %s388_s18 = sshll.u32 %s121_s14, 2  ;;  %s389_s21 = sshll.u32 %s601_s12, 6 }
  0x2e   : > { %p35_p13 = por %p34_p2, %p851_p12  ;;  %s729_s19 = scalar_lea.hbm %s836_s0, %s389_s21 }
  0x2f   : > { %s125_s23 = scalar_lea.vmem [#allocation3], %s388_s18  ;;  %s122_s27 = scalar_lea.sflag [#allocation4], %s121_s14 }
  0x30   : > { %s132_s24 = sshll.u32 %s125_s23, 4  ;;  %p731_p11 = pnand %p428_p9, %p35_p13  ;;  %s735_s24 = int_to_ptr.vmem [resolvable:$true] %s132_s24 }
  0x31   : > { %s501_s28 = scalar_lea.hbm %s729_s19, 64  ;;  %s506_s3 = scalar_lea.hbm %s836_s0, 128 }
  0x32   : > { %p502_p0 = scmp.ne.s32.totalorder %s729_s19, %s501_s28  ;;  %p503_p3 = pneg %p731_p11 }
  0x33   : > { %p507_p10 = scmp.lt.u32.totalorder %s729_s19, %s836_s0  ;;  %p508_p1 = scmp.lt.u32.totalorder %s506_s3, %s501_s28 }
  0x34   : > { %p504_p5 = pnand %p503_p3, %p502_p0  ;;  %p510_p4 = scmp.lt.u32.totalorder %s501_s28, %s729_s19 }
  0x35   : > { %p509_p2 = por %p508_p1, %p507_p10 }
  0x36   : > { %p505_p7 = pneg %p504_p5 }
  0x37   : > { %p511_p6 = por %p510_p4, %p509_p2 }
  0x39   : > { %p512_p9 = pnand %p511_p6, %p505_p7 }
  0x3b   : > { %515 = shalt.err (!%p512_p9)
}
  0x3c   : > { %s516_s6 = scalar_lea.vmem %s735_s24, 64  ;;  %s604_s14 = smov [#allocation3]  }
  0x3d   : > { %p517_p12 = scmp.ne.s32.totalorder %s735_s24, %s516_s6  ;;  %s521_s18 = sshll.u32 %s604_s14, 4  ;;  %s522_s18 = int_to_ptr.vmem [resolvable:$false] %s521_s18 }
  0x3e   : > { %s523_s21 = scalar_lea.vmem %s522_s18, 128  ;;  %p524_p5 = scmp.lt.s32.totalorder %s735_s24, %s522_s18 }
  0x3f   : > { %p519_p13 = pnand %p517_p12, %p503_p3  ;;  %p525_p10 = scmp.lt.s32.totalorder %s523_s21, %s516_s6 }
  0x41   : > { %p520_p0 = pneg %p519_p13  ;;  %p526_p1 = por %p525_p10, %p524_p5 }
  0x43   : > { %p527_p2 = pnand %p526_p1, %p520_p0 }
  0x45   : > { %530 = shalt.err (!%p527_p2)
}
  0x46   : > { %422 = dma.hbm_to_vmem [thread:$0]  (!%p731_p11), %s729_s19, 64, %s735_s24, %s122_s27  }
  0x47   : > { %p853_p7 = scmp.ne.s32.totalorder %s844_s17, 0 }
  0x48   : > { %s765_s22 = sand.u32 (!%p853_p7), 1, %s593_s10   ;;  %p854_p3 = scmp.ne.s32.totalorder (!%p853_p7), %s842_s15, 0 }
  0x49   : > { %141 = sbr.rel (%p853_p7) target bundleno = 778 (0x30a), region = 28  ;;  %s391_s25 = sshll.u32 (!%p853_p7), %s765_s22, 2 }
  0x4a   : > { %s144_s23 = scalar_lea.sflag (!%p853_p7), [#allocation4], %s765_s22  ;;  %s771_s28 = scalar_lea.vmem (!%p853_p7), [#allocation3], %s391_s25 }
  0x50   : > { %576 = dma.done.wait (%p854_p3), %s144_s23, 64  }
  0x51   : > { %578 = vsyncadd (%p854_p3), %s144_s23, 4294967232  ;;  %p855_p11 = scmp.eq.s32.totalorder %s645_s13, 0 }
  0x53   : > { %580 = dma.done.wait (%p855_p11), [#allocation7], 128   ;;  %p856_p4 = pmov %p855_p11 }
  0x54   : > { %vm172_vm0 = vcmask 11264   ;;  %v605_v0 = vmov 0.0   ;;  %vm606_vm1 = vmmov 0   ;;  %vm182_vm2 = vcmask 125952   ;;  %v181_v1 = vld [vmem:[%s771_s28] sm:$0xf] }
  0x55   : > { %582 = vsyncadd (%p856_p4), [#allocation7], 4294967168  ;;  %173 = vst.msk [vmem:[#allocation2] sm:$0xf] %vm172_vm0, %v605_v0  ;;  %402 = vmatprep.subr.mxu0 %v605_v0  ;;  %404 = vmatprep.mubr.msk.f32.mxu0 %vm606_vm1, %v605_v0  ;;  %v174_v2 = vld [vmem:[%s771_s28] sm:$0xf] }
  0x56   : > { %183 = vst.msk [vmem:[#allocation2 + $0x4] sm:$0xf] %vm182_vm2, %v181_v1  ;;  %s607_s15 = smov 2   ;;  %vm179_vm3 = vcmask 125968   ;;  %v184_v4 = vld [vmem:[#allocation6] sm:$0xff]  ;;  %vm186_vm4 = vcmask 64512  }
  0x57   : > { %176 = vrot.lane.b32.xlu0 %v174_v2, %s607_s15  ;;  %vm260_vm5 = vcmask 130048   ;;  %v275_v23 = vld [vmem:[%s771_s28] sm:$0xf]  ;;  %s397_s17 = sshll.u32 %s645_s13, 6  ;;  %s171_s19 = scalar_lea.vmem [#allocation8], %s391_s25 }
  0x58   : > { %s304_s24 = sshll.u32 %s171_s19, 4  ;;  %s791_s29 = scalar_lea.hbm %s838_s2, %s397_s17  ;;  %s793_s24 = int_to_ptr.vmem [resolvable:$true] %s304_s24 }
  0x59   : > { %s291_s30 = scalar_lea.sflag [#allocation5], %s765_s22  ;;  %s531_s13 = scalar_lea.vmem %s793_s24, 64 }
  0x5a   : > { %p532_p6 = scmp.ne.s32.totalorder %s793_s24, %s531_s13  ;;  %s608_s3 = smov [#allocation8]  }
  0x5b   : > { %s535_s4 = sshll.u32 %s608_s3, 4  ;;  %s536_s4 = int_to_ptr.vmem [resolvable:$false] %s535_s4 }
  0x5c   : > { %p533_p9 = pnand %p532_p6, %p716_p8  ;;  %s537_s5 = scalar_lea.vmem %s536_s4, 128 }
  0x5d   : > { %p538_p13 = scmp.lt.s32.totalorder %s793_s24, %s536_s4  ;;  %p539_p0 = scmp.lt.s32.totalorder %s537_s5, %s531_s13 }
  0x5e   : > { %p534_p12 = pneg %p533_p9 }
  0x5f   : > { %p540_p5 = por %p539_p0, %p538_p13 }
  0x61   : > { %p541_p10 = pnand %p540_p5, %p534_p12 }
  0xc9   : > { %v177_v3 = vpop.permute.xlu0 %176 }
  0xca   : > { %180 = vst.msk [vmem:[#allocation2] sm:$0xf] %vm179_vm3, %v177_v3 }
  0xd1   : > { %v185_v5 = vld [vmem:[#allocation2] sm:$0xff] }
  0xd2   : > { %403 = vmatpush3.msra.mxu0 %v185_v5 }
  0xd3   : > { %405 = vmatmul.mubr.msk.f32.vlgmr.msra.gmra.mrb[0].mxu0 %vm186_vm4, %v184_v4 }
 0x1a6   : > { %v256_v6 = vpop.f32.mrb[0].mxu0 }
 0x1a7   : > { %v406_v7 = vpop.f32.mrb[1].mxu0  ;;  %v261_v8 = vsel %vm260_vm5, %v256_v6, 0.0 }
 0x1a8   : > { %262 = vadd.xlane.f32.xlu0 %v261_v8 }
 0x235   : > { %v263_v9 = vpop.xlane.xlu0 %262 }
 0x236   : > { %v265_v10 = vmul.f32 0.0625, %v263_v9 }
 0x238   : > { %v266_v11 = vsub.f32 %v256_v6, %v265_v10 }
 0x23a   : > { %v267_v12 = vmul.f32 %v266_v11, %v266_v11 }
 0x23c   : > { %v268_v13 = vsel %vm260_vm5, %v267_v12, 0.0 }
 0x23d   : > { %269 = vadd.xlane.f32.xlu1 %v268_v13 }
 0x2ca   : > { %v270_v14 = vpop.xlane.xlu1 %269 }
 0x2cb   : > { %v271_v15 = vmul.f32 0.0625, %v270_v14 }
 0x2cd   : > { %v272_v16 = vadd.f32 1e-05, %v271_v15 }
 0x2cf   : > { %467 = vrsqrt.f32 %v272_v16 }
 0x2d9   : > { %v468_v17 = vpop.eup %467 }
 0x2da   : > { %v274_v18 = vmul.f32 %v468_v17, %v266_v11 }
 0x2dc   : > { %v395_v19 = vmul.f32 -1.442695, %v274_v18  ;;  %v283_v24 = vrot.slane %v274_v18, 4 }
 0x2de   : > { %469 = vpow2.f32 %v395_v19 }
 0x2e8   : > { %v470_v20 = vpop.eup %469 }
 0x2e9   : > { %v279_v21 = vadd.f32 1.0, %v470_v20 }
 0x2eb   : > { %471 = vrcp.f32 %v279_v21 }
 0x2f5   : > { %v472_v22 = vpop.eup %471 }
 0x2f6   : > { %v286_v25 = vsub.f32 1.0, %v472_v22  ;;  %v285_v26 = vmul.f32 %v472_v22, %v283_v24 }
 0x2f8   : > { %v287_v27 = vmul.f32 %v286_v25, %v275_v23 }
 0x2fa   : > { %v288_v28 = vadd.f32 %v287_v27, %v285_v26 }
 0x2fc   : > { %289 = vst.msk [vmem:[%s171_s19] sm:$0xf] %vm182_vm2, %v288_v28 }
 0x2fd   : > { %544 = shalt.err (!%p541_p10)
}
 0x2fe   : > { %s545_s6 = scalar_lea.hbm %s791_s29, 64  ;;  %s549_s21 = scalar_lea.hbm %s838_s2, 128 }
 0x2ff   : > { %p546_p1 = scmp.ne.s32.totalorder %s791_s29, %s545_s6  ;;  %p550_p3 = scmp.lt.u32.totalorder %s791_s29, %s838_s2 }
 0x300   : > { %p551_p11 = scmp.lt.u32.totalorder %s549_s21, %s545_s6  ;;  %p553_p6 = scmp.lt.u32.totalorder %s545_s6, %s791_s29 }
 0x301   : > { %p547_p2 = pnand %p546_p1, %p716_p8 }
 0x302   : > { %p552_p4 = por %p551_p11, %p550_p3 }
 0x303   : > { %p548_p7 = pneg %p547_p2 }
 0x304   : > { %p554_p9 = por %p553_p6, %p552_p4 }
 0x306   : > { %p555_p12 = pnand %p554_p9, %p548_p7 }
 0x308   : > { %558 = shalt.err (!%p555_p12)
}
 0x309   : > { %413 = dma.vmem_to_hbm [thread:$0]  (%p716_p8), %s793_s24, 64, %s791_s29, %s291_s30  }
 0x30a PF: > { %s316_s23 = sand.u32 1, %s589_s9   ;;  %p857_p13 = scmp.ne.s32.totalorder %s843_s16, 0 }
 0x30b   : > { %p858_p0 = scmp.ge.s32.totalorder %s601_s12, 2  ;;  %s317_s28 = scalar_lea.sflag [#allocation5], %s316_s23 }
 0x30d   : > { %p424_p5 = pnand %p858_p0, %p857_p13 }
 0x30f   : > { %584 = dma.done.wait (!%p424_p5), %s317_s28, 64  }
 0x310   : > { %586 = vsyncadd (!%p424_p5), %s317_s28, 4294967232  ;;  %p16_p10 = scmp.ge.s32.totalorder %s672_s20, 4   ;;  %s859_s9 = smov %s593_s10 }
 0x311   : > { %s860_s10 = smov %s597_s11  ;;  %s861_s11 = smov %s708_s7 }
 0x312   : > { %s862_s12 = smov %s672_s20  ;;  %18 = sbr.rel (!%p16_p10) target bundleno = 6 (0x6), region = 77 }
 0x319   :  { %322 = vsyncpa [#allocation4], 1 }
 0x31a   :  { %324 = vsyncpa [#allocation4 + $0x1], 1 }
 0x31b   :  { %325 = vsyncpa [#allocation7], 1 }
 0x31c   :  { %326 = vsyncpa [#allocation5], 1 }
 0x31d   :  { %328 = vsyncpa [#allocation5 + $0x1], 1 }

</bundles_post_ra>
